<compile_context>
chip_gen: v5e
topology: v5e:2x2
jax: 0.10.0
libtpu: 0.0.40
codegen_flags: <defaults>
</compile_context>

<pallas_src>
from functools import partial

import jax
import jax.numpy as jnp
from jax.experimental import pallas as pl
from jax.experimental.pallas import tpu as pltpu


def mlp_kernel(x_ref, colp_ref, w_mid_ref, o_ref, *, n_mid):
    """One lane-tile of the transposed MLP forward.

    x_ref:     (1, TN)                batch points on the lane axis
    colp_ref:  (H, n_mid + 4)         packed vectors (see packing contract above)
    w_mid_ref: (max(n_mid, 1), H, H)  middle weights, PyTorch (out, in) layout
    o_ref:     (1, TN)
    """
    x = x_ref[...]                                   # (1, TN)
    colp = colp_ref[...]                             # (H, n_mid + 4)

    # Input layer: rank-1 -> broadcast FMA on the VPU (no MXU), tanh on the EUP.
    # NOTE: padded tail lanes hold x=0 and compute tanh(b_in)-derived garbage;
    # it is bounded (no NaN/Inf) and sliced off in the wrapper.  A future fused
    # loss must mask these lanes out.
    w_in = colp[:, 0:1]                              # (H, 1)
    b_in = colp[:, 1:2]                              # (H, 1)
    h = jnp.tanh(w_in * x + b_in)                    # (H, TN)

    # Middle layers: (H, H) @ (H, TN) on the MXU, full-f32 precision.
    # Static Python loop is fine at small depth; switch to
    # lax.fori_loop(..., unroll=True) if n_mid ever grows beyond ~8.
    for m in range(n_mid):
        b = colp[:, 2 + m:3 + m]                     # (H, 1)
        h = jnp.tanh(
            jnp.dot(w_mid_ref[m], h,
                    preferred_element_type=jnp.float32,
                    precision=jax.lax.Precision.HIGHEST) + b)

    # Output layer: fan_out = 1 -> VPU multiply + sublane reduction (no MXU).
    w_out = colp[:, 2 + n_mid:3 + n_mid]             # (H, 1)
    b_out = colp[0:1, 3 + n_mid:4 + n_mid]           # (1, 1)  (packing contract)
    o_ref[...] = jnp.sum(w_out * h, axis=0, keepdims=True) + b_out


def _pack_col_params(params):
    """Pack every vector-shaped parameter into a single (H, M+4) buffer."""
    w_in, b_in, w_mid, b_mid, w_out, b_out = params
    H = w_in.shape[0]
    M = w_mid.shape[0]
    b_out_col = jnp.zeros((H,), jnp.float32).at[0].set(b_out[0])
    cols = [w_in[:, 0], b_in] + [b_mid[m] for m in range(M)] + [w_out[0, :], b_out_col]
    return jnp.stack(cols, axis=1)                   # (H, M + 4)


def _round_up(n, m):
    return ((n + m - 1) // m) * m


def _choose_tiling(n, max_tile_n):
    """Pick (tile_n, n_total) so the lane tile is as wide as possible while the
    grid keeps >= 2 'parallel' steps (lets v7x split across its 2 TensorCores).
    """
    tile_n = min(max_tile_n, _round_up(pl.cdiv(n, 2), 128))
    tile_n = max(tile_n, 128)
    n_total = max(_round_up(n, tile_n), 2 * tile_n)
    return tile_n, n_total


def net_forward(x, params, *, max_tile_n=8192):
    """Forward pass of Net for x of shape (N, 1); returns (N, 1).

    For the real PINN use-case, pass ALL collocation points in one call so a
    single pallas_call amortizes launch + grid overheads over the point cloud.
    """
    w_in, b_in, w_mid, b_mid, w_out, b_out = params
    H = w_in.shape[0]
    M = w_mid.shape[0]
    N = x.shape[0]

    colp = _pack_col_params(params)
    # num_hidden == 1 -> zero middle layers; pass a dummy (unused) weight block
    # so Pallas never sees a zero-sized operand.
    w_mid_in = w_mid if M > 0 else jnp.zeros((1, H, H), jnp.float32)

    tile_n, n_total = _choose_tiling(N, max_tile_n)

    # Lane-dense layout without a transpose HLO: (N, 1) -> (1, N) is a
    # layout-trivial reshape; padding is a no-op when N == n_total.
    x_row = x.reshape(1, N)
    x_row = jnp.pad(x_row, ((0, 0), (0, n_total - N)))

    y_row = pl.pallas_call(
        partial(mlp_kernel, n_mid=M),
        out_shape=jax.ShapeDtypeStruct((1, n_total), jnp.float32),
        grid=(n_total // tile_n,),
        in_specs=[
            pl.BlockSpec((1, tile_n), lambda i: (0, i)),        # x lane-tile
            pl.BlockSpec(colp.shape, lambda i: (0, 0)),         # packed vectors (resident)
            pl.BlockSpec(w_mid_in.shape, lambda i: (0, 0, 0)),  # middle weights (resident)
        ],
        out_specs=pl.BlockSpec((1, tile_n), lambda i: (0, i)),
        compiler_params=pltpu.CompilerParams(
            dimension_semantics=("parallel",)),                 # v7x: both TCs split the batch
    )(x_row, colp, w_mid_in)

    # Slice off padded lanes and restore (N, 1) via a layout-trivial reshape.
    return y_row[:, :N].reshape(N, 1)


def init_params(key, num_hidden, size_hidden):
    """nn.Linear-style init U(-1/sqrt(fan_in), 1/sqrt(fan_in)), PyTorch (out, in) layout."""
    H = size_hidden
    M = num_hidden - 1
    ks = jax.random.split(key, 6)

    def u(k, shape, fan_in):
        bound = 1.0 / jnp.sqrt(jnp.float32(fan_in))
        return jax.random.uniform(k, shape, jnp.float32, -bound, bound)

    w_in = u(ks[0], (H, 1), 1)          # layer_in.weight
    b_in = u(ks[1], (H,), 1)            # layer_in.bias
    w_mid = u(ks[2], (M, H, H), H)      # stacked middle weights
    b_mid = u(ks[3], (M, H), H)         # stacked middle biases
    w_out = u(ks[4], (1, H), H)         # layer_out.weight
    b_out = u(ks[5], (1,), H)           # layer_out.bias
    return (w_in, b_in, w_mid, b_mid, w_out, b_out)


def net_forward_ref(x, params):
    """Pure-JAX reference (PyTorch semantics: x @ W.T + b)."""
    w_in, b_in, w_mid, b_mid, w_out, b_out = params
    out = jnp.tanh(x @ w_in.T + b_in)
    for m in range(w_mid.shape[0]):
        out = jnp.tanh(out @ w_mid[m].T + b_mid[m])
    return out @ w_out.T + b_out


if __name__ == "__main__":
    num_hidden = 3      # -> 2 middle Linear(H, H) layers
    size_hidden = 32
    batch = 512         # collocation points on the lane axis (2 x 256-lane tiles)

    key = jax.random.PRNGKey(0)
    k_params, k_x, k_params1, k_x1, k_x2 = jax.random.split(key, 5)

    params = init_params(k_params, num_hidden, size_hidden)
    x = jax.random.uniform(k_x, (batch, 1), jnp.float32)   # time points t in [0, 1)

    y = net_forward(x, params)
    jax.block_until_ready(y)

    y_ref = net_forward_ref(x, params)
    assert y.shape == (batch, 1)
    assert jnp.allclose(y, y_ref, atol=2e-5, rtol=2e-5), float(jnp.max(jnp.abs(y - y_ref)))

    # Edge case: num_hidden = 1 -> no middle layers, tiny ragged batch.
    params1 = init_params(k_params1, 1, size_hidden)
    x1 = jax.random.uniform(k_x1, (8, 1), jnp.float32)
    y1 = net_forward(x1, params1)
    jax.block_until_ready(y1)
    assert jnp.allclose(y1, net_forward_ref(x1, params1), atol=2e-5, rtol=2e-5)

    # Larger collocation batch: exercises the wide-tile path (tile_n > 256).
    x2 = jax.random.uniform(k_x2, (3000, 1), jnp.float32)  # ragged vs tile size
    y2 = net_forward(x2, params)
    jax.block_until_ready(y2)
    assert jnp.allclose(y2, net_forward_ref(x2, params), atol=2e-5, rtol=2e-5)

    print("KERNEL_OK")
</pallas_src>

<mosaic_0001>
module attributes {stable_mosaic.version = 11 : i64} {
  func.func @mlp_kernel(%arg0: i32, %arg1: memref<1x256xf32, #tpu.memory_space<vmem>>, %arg2: memref<32x6xf32, #tpu.memory_space<vmem>>, %arg3: memref<2x32x32xf32, #tpu.memory_space<vmem>>, %arg4: memref<1x256xf32, #tpu.memory_space<vmem>>) attributes {dimension_semantics = [#tpu.dimension_semantics<parallel>], iteration_bounds = array<i64: 2>, scalar_prefetch = 0 : i64, scratch_operands = 0 : i64, tpu.core_type = #tpu.core_type<tc>, window_params = [{transform_indices = @transform_0, window_bounds = array<i64: 1, 256>}, {pipeline_mode = #tpu.pipeline_mode<synchronous>, transform_indices = @transform_1, window_bounds = array<i64: 32, 6>}, {pipeline_mode = #tpu.pipeline_mode<synchronous>, transform_indices = @transform_2, window_bounds = array<i64: 2, 32, 32>}, {transform_indices = @transform_3, window_bounds = array<i64: 1, 256>}]} {
    %c0 = arith.constant 0 : index
    %c0_0 = arith.constant 0 : index
    %0 = vector.load %arg1[%c0, %c0_0] : memref<1x256xf32, #tpu.memory_space<vmem>>, vector<1x256xf32>
    %c0_1 = arith.constant 0 : index
    %c0_2 = arith.constant 0 : index
    %1 = vector.load %arg2[%c0_1, %c0_2] : memref<32x6xf32, #tpu.memory_space<vmem>>, vector<32x6xf32>
    %2 = vector.extract_strided_slice %1 {offsets = [0, 0], sizes = [32, 1], strides = [1, 1]} : vector<32x6xf32> to vector<32x1xf32>
    %3 = vector.extract_strided_slice %1 {offsets = [0, 1], sizes = [32, 1], strides = [1, 1]} : vector<32x6xf32> to vector<32x1xf32>
    %4 = vector.broadcast %2 : vector<32x1xf32> to vector<32x256xf32>
    %5 = vector.broadcast %0 : vector<1x256xf32> to vector<32x256xf32>
    %6 = arith.mulf %4, %5 : vector<32x256xf32>
    %7 = vector.broadcast %3 : vector<32x1xf32> to vector<32x256xf32>
    %8 = arith.addf %6, %7 : vector<32x256xf32>
    %9 = math.tanh %8 : vector<32x256xf32>
    %10 = vector.extract_strided_slice %1 {offsets = [0, 2], sizes = [32, 1], strides = [1, 1]} : vector<32x6xf32> to vector<32x1xf32>
    %c0_3 = arith.constant 0 : index
    %c0_4 = arith.constant 0 : index
    %c0_5 = arith.constant 0 : index
    %11 = vector.load %arg3[%c0_3, %c0_4, %c0_5] : memref<2x32x32xf32, #tpu.memory_space<vmem>>, vector<1x32x32xf32>
    %12 = vector.shape_cast %11 : vector<1x32x32xf32> to vector<32x32xf32>
    %cst = arith.constant dense<0.000000e+00> : vector<32x256xf32>
    %13 = tpu.matmul %12, %9, %cst {dimension_numbers = #tpu.dot_dimension_numbers<[1], [0], [0], [1], [0, 0, 1, 1], [], []>, precision = #tpu.contract_precision<fp32>} : vector<32x32xf32>, vector<32x256xf32>, vector<32x256xf32> -> vector<32x256xf32>
    %14 = vector.broadcast %10 : vector<32x1xf32> to vector<32x256xf32>
    %15 = arith.addf %13, %14 : vector<32x256xf32>
    %16 = math.tanh %15 : vector<32x256xf32>
    %17 = vector.extract_strided_slice %1 {offsets = [0, 3], sizes = [32, 1], strides = [1, 1]} : vector<32x6xf32> to vector<32x1xf32>
    %c1 = arith.constant 1 : index
    %c0_6 = arith.constant 0 : index
    %c0_7 = arith.constant 0 : index
    %18 = vector.load %arg3[%c1, %c0_6, %c0_7] : memref<2x32x32xf32, #tpu.memory_space<vmem>>, vector<1x32x32xf32>
    %19 = vector.shape_cast %18 : vector<1x32x32xf32> to vector<32x32xf32>
    %cst_8 = arith.constant dense<0.000000e+00> : vector<32x256xf32>
    %20 = tpu.matmul %19, %16, %cst_8 {dimension_numbers = #tpu.dot_dimension_numbers<[1], [0], [0], [1], [0, 0, 1, 1], [], []>, precision = #tpu.contract_precision<fp32>} : vector<32x32xf32>, vector<32x256xf32>, vector<32x256xf32> -> vector<32x256xf32>
    %21 = vector.broadcast %17 : vector<32x1xf32> to vector<32x256xf32>
    %22 = arith.addf %20, %21 : vector<32x256xf32>
    %23 = math.tanh %22 : vector<32x256xf32>
    %24 = vector.extract_strided_slice %1 {offsets = [0, 4], sizes = [32, 1], strides = [1, 1]} : vector<32x6xf32> to vector<32x1xf32>
    %25 = vector.extract_strided_slice %1 {offsets = [0, 5], sizes = [1, 1], strides = [1, 1]} : vector<32x6xf32> to vector<1x1xf32>
    %26 = vector.broadcast %24 : vector<32x1xf32> to vector<32x256xf32>
    %27 = arith.mulf %26, %23 : vector<32x256xf32>
    %cst_9 = arith.constant dense<0.000000e+00> : vector<256xf32>
    %28 = vector.multi_reduction <add>, %27, %cst_9 [0] : vector<32x256xf32> to vector<256xf32>
    %29 = vector.shape_cast %28 : vector<256xf32> to vector<1x256xf32>
    %30 = vector.broadcast %25 : vector<1x1xf32> to vector<1x256xf32>
    %31 = arith.addf %29, %30 : vector<1x256xf32>
    %c0_10 = arith.constant 0 : index
    %c0_11 = arith.constant 0 : index
    %32 = vector.load %arg4[%c0_10, %c0_11] : memref<1x256xf32, #tpu.memory_space<vmem>>, vector<1x256xf32>
    tpu.vector_store %arg4[%c0_10, %c0_11], %31 {strides = array<i32>} : memref<1x256xf32, #tpu.memory_space<vmem>>, vector<1x256xf32>,
    return
  }
  func.func @transform_0(%arg0: i32) -> (i32, i32) {
    %c0_i32 = arith.constant 0 : i32
    %c0_i32_0 = arith.constant 0 : i32
    return %c0_i32, %arg0 : i32, i32
  }
  func.func @transform_1(%arg0: i32) -> (i32, i32) {
    %c0_i32 = arith.constant 0 : i32
    %c0_i32_0 = arith.constant 0 : i32
    %c0_i32_1 = arith.constant 0 : i32
    return %c0_i32, %c0_i32_0 : i32, i32
  }
  func.func @transform_2(%arg0: i32) -> (i32, i32, i32) {
    %c0_i32 = arith.constant 0 : i32
    %c0_i32_0 = arith.constant 0 : i32
    %c0_i32_1 = arith.constant 0 : i32
    %c0_i32_2 = arith.constant 0 : i32
    return %c0_i32, %c0_i32_0, %c0_i32_1 : i32, i32, i32
  }
  func.func @transform_3(%arg0: i32) -> (i32, i32) {
    %c0_i32 = arith.constant 0 : i32
    %c0_i32_0 = arith.constant 0 : i32
    return %c0_i32, %arg0 : i32, i32
  }
}

</mosaic_0001>

<bundles_post_ra>
// kernel: tpu_custom_call.1
= control target key start
LH: loop header
LB: loop body
LE: loop exit
PB: predicated region body
PF: predicated region fallthrough
CT: control target
= control target key end

     0   :  { %8 = vsyncpa [#allocation3], 0  ;;  %s2353_s0 = inlined_call_operand.vmem [shape: f32[1,512], index: 0, kind: input, shape index: {}]   ;;  %s2354_s1 = inlined_call_operand.vmem [shape: f32[32,6], index: 1, kind: input, shape index: {}]   ;;  %s2355_s2 = inlined_call_operand.hbm [shape: f32[2,32,32], index: 2, kind: input, shape index: {}]   ;;  %s2356_s3 = inlined_call_operand.hbm [shape: f32[1,512], index: 3, kind: output, shape index: {}]  }
   0x1   :  { %9 = vsyncpa [#allocation4], 0 }
   0x2   :  { %11 = vsyncpa [#allocation4 + $0x1], 0  ;;  %s1855_s12 = smov 0   ;;  %s1857_s13 = smov 0  }
   0x3   :  { %s1859_s14 = smov 0   ;;  %s1861_s15 = smov 0  }
   0x4 LB: > { %s1876_s16 = sadd.s32 4294967295, %s1824_s15   ;;  %s1593_s17 = sadd.s32 4294967294, %s1824_s15   ;;  %s1824_s15 = sphi %s1861_s15, %s2362_s15   ;;  %s1820_s14 = sphi %s1859_s14, %s2361_s14   ;;  %s1816_s13 = sphi %s1857_s13, %s2360_s13   ;;  %s1812_s12 = sphi %s1855_s12, %s2359_s12  }
   0x5   : > { %s1880_s18 = sadd.s32 1, %s1824_s15   ;;  %s92_s19 = sadd.s32 1, %s1820_s14 }
   0x6   : > { %s89_s20 = ssub.s32 %s1824_s15, %s1880_s18  ;;  %p102_p0 = scmp.ne.s32.totalorder %s1820_s14, %s1816_s13 }
   0x7   : > { %p90_p1 = scmp.eq.s32.totalorder %s89_s20, 0  ;;  %p103_p2 = scmp.eq.s32.totalorder %s1876_s16, 1 }
   0x8   : > { %p108_p3 = scmp.ne.s32.totalorder %s1816_s13, %s1812_s12  ;;  %p109_p4 = scmp.eq.s32.totalorder %s1593_s17, 1 }
   0x9   : > { %s1891_s21 = scalar_select %p90_p1, %s1820_s14, %s92_s19  }
   0xa   : > { %p1893_p5 = por %p103_p2, %p102_p0  ;;  %p1897_p6 = por %p109_p4, %p108_p3 }
   0xb   : > { %p1594_p7 = scmp.ge.s32.totalorder %s1824_s15, 1  ;;  %p116_p8 = scmp.lt.s32.totalorder %s1824_s15, 3 }
   0xc   : > { %p1619_p9 = scmp.eq.s32.totalorder %s1876_s16, 0  ;;  %s130_s26 = sshll.u32 %s2355_s2, 4  ;;  %s131_s26 = int_to_ptr.hbm [resolvable:$true] %s130_s26 }
   0xd   : > { %p117_p10 = pnand %p1594_p7, %p116_p8  ;;  %s1826_s27 = smov [#allocation2]  }
   0xe   : > { %s132_s28 = sshll.u32 %s1826_s27, 4  ;;  %s1827_s29 = smov 128   ;;  %s133_s28 = int_to_ptr.vmem [resolvable:$true] %s132_s28 }
   0xf   : > { %p1611_p11 = pneg %p117_p10  ;;  %s1828_s30 = smov 8  }
  0x10   : > { %156 = sbr.rel (%p117_p10) target bundleno = 650 (0x28a), region = 32 }
  0x11   : > { %p1612_p12 = pnand %p1619_p9, %p1611_p11 }
  0x13   : > { %1614 = dma.hbm_to_vmem [thread:$0]  (!%p1612_p12), %s131_s26, 1024, %s133_s28, [#allocation3], %s1827_s29, %s1827_s29, %s1828_s30  }
  0x15   : > { %1803 = dma.done.wait (%p1619_p9), [#allocation3], 1024  }
  0x16   : > { %1805 = vsyncadd (%p1619_p9), [#allocation3], 4294966272  ;;  %v1829_v0 = vmov 1   ;;  %v1830_v1 = vmov 0   ;;  %v1916_v2 = vld [vmem:[%s2354_s1 + $0x18] sm:$0xff]  ;;  %v1923_v3 = vld [vmem:[%s2354_s1 + $0x10] sm:$0xff] }
  0x17   : > { %1664 = vset.pattern.permute.xlu1 %v1829_v0  ;;  %1663 = vset.pattern.permute.xlu0 %v1830_v1  ;;  %v1929_v4 = vld [vmem:[%s2354_s1 + $0x8] sm:$0xff]  ;;  %v1936_v5 = vld [vmem:[%s2354_s1] sm:$0xff]  ;;  %s1942_s17 = sshll.u32 %s1876_s16, 1  ;;  %vm276_vm0 = vcmask 261120   ;;  %v1831_v52 = vmov 2   ;;  %s177_s16 = sand.u32 1, %s1816_s13  }
  0x18   : > { %1666 = vset.pattern.permute.xlu2 %v1829_v0  ;;  %237 = vperm.xlu1 %1664, %v1916_v2   ;;  %p181_p13 = scmp.lt.s32.totalorder %s1942_s17, 3  ;;  %v256_v16 = vld [vmem:[#allocation2] sm:$0xff]  ;;  %v257_v33 = vld [vmem:[#allocation2 + $0x8] sm:$0xff]  ;;  %s1599_s26 = sshll.u32 %s177_s16, 1  ;;  %vm1501_vm1 = vcmask 1040384  }
  0x19   : > { %208 = vperm.xlu0 %1663, %v1916_v2   ;;  %233 = vperm.xlu2 %1666, %v1923_v3   ;;  %v278_v21 = vsel %vm276_vm0, %v256_v16, 0  ;;  %v281_v43 = vsel %vm276_vm0, %v257_v33, 0  ;;  %s1520_s29 = scalar_lea.hbm %s2356_s3, %s1942_s17  ;;  %s179_s30 = scalar_lea.vmem [#allocation5], %s1599_s26 }
  0x1a   : > { %s182_s19 = scalar_select %p181_p13, %s1942_s17, 3  ;;  %v1952_v28 = vand.u32 4294901760, %v278_v21  ;;  %v1984_v55 = vand.u32 4294901760, %v281_v43 }
  0x1b   : > { %s1522_s4 = sshll.u32 %s179_s30, 4  ;;  %s1524_s5 = sshll.u32 %s1520_s29, 4  ;;  %s1523_s4 = int_to_ptr.vmem [resolvable:$true] %s1522_s4  ;;  %s1525_s5 = int_to_ptr.hbm [resolvable:$true] %s1524_s5 }
  0x1c   : > { %s183_s25 = scalar_lea.vmem %s2353_s0, %s182_s19  ;;  %v1964_v37 = vsub.f32 %v278_v21, %v1952_v28  ;;  %v1996_v63 = vsub.f32 %v281_v43, %v1984_v55  ;;  %s1510_s6 = scalar_lea.sflag [#allocation4], %s177_s16 }
  0x1d   : > { %v186_v6 = vld [vmem:[%s183_s25] sm:$0x3]  ;;  %s1772_s7 = sshra.s32 %s1525_s5, 4  ;;  %s1778_s11 = scalar_lea.hbm %s2356_s3, 4  ;;  %s1773_s7 = int_to_ptr.hbm [resolvable:$true] %s1772_s7 }
  0x1e   : > { %v212_v7 = vperm.slane %v186_v6, 0  ;;  %v213_v8 = vperm.slane %v186_v6, 1  ;;  %v1976_v51 = vand.u32 4294901760, %v1964_v37  ;;  %s1774_s8 = scalar_lea.hbm %s1773_s7, 2  ;;  %p1779_p3 = scmp.lt.s32.totalorder %s1773_s7, %s2356_s3 }
  0x1f   : > { %p1775_p0 = scmp.ne.s32.totalorder %s1773_s7, %s1774_s8  ;;  %p1780_p4 = scmp.lt.s32.totalorder %s1778_s11, %s1774_s8 }
  0x20   : > { %1665 = vset.pattern.permute.xlu1 %v1830_v1  ;;  %v312_v59 = vsub.f32 %v1964_v37, %v1976_v51 }
  0x21   : > { %203 = vperm.xlu0 %1663, %v1923_v3   ;;  %198 = vperm.xlu1 %1665, %v1929_v4   ;;  %p1776_p1 = pnand %p1775_p0, %p1893_p5  ;;  %p1781_p7 = por %p1780_p4, %p1779_p3 }
  0x22   : > { %1667 = vset.pattern.permute.xlu2 %v1830_v1 }
  0x23   : > { %193 = vperm.xlu2 %1667, %v1936_v5   ;;  %p1777_p2 = pneg %p1776_p1 }
  0x25   : > { %p1782_p8 = pnand %p1781_p7, %p1777_p2 }
  0x29   : > { %1668 = vset.pattern.permute.xlu0 %v1829_v0  ;;  %1669 = vset.pattern.permute.xlu1 %v1829_v0  ;;  %v258_v0 = vld [vmem:[#allocation2 + $0x10] sm:$0xff] }
  0x2a   : > { %229 = vperm.xlu0 %1668, %v1929_v4   ;;  %225 = vperm.xlu1 %1669, %v1936_v5  }
  0x2b   : > { %1670 = vset.pattern.permute.xlu2 %v1831_v52 }
  0x2c   : > { %273 = vperm.xlu2 %1670, %v1916_v2  }
  0x32   : > { %1672 = vset.pattern.permute.xlu0 %v1831_v52  ;;  %1671 = vset.pattern.permute.xlu1 %v1831_v52 }
  0x33   : > { %261 = vperm.xlu0 %1672, %v1936_v5   ;;  %269 = vperm.xlu1 %1671, %v1923_v3  }
  0x34   : > { %265 = vperm.xlu2 %1670, %v1929_v4  }
  0x73   : > { %v234_v13 = vpop.permute.xlu2 %233 }
  0x7d   : > { %v194_v27 = vpop.permute.xlu2 %193 }
  0x7e   : > { %v216_v31 = vmul.f32 %v212_v7, %v194_v27  ;;  %v217_v32 = vmul.f32 %v213_v8, %v194_v27 }
  0x8a   : > { %v238_v10 = vpop.permute.xlu1 %237 }
  0x8b   : > { %v209_v9 = vpop.permute.xlu0 %208 }
  0x8c   : > { %v222_v11 = vmul.f32 %v212_v7, %v209_v9  ;;  %v223_v12 = vmul.f32 %v213_v8, %v209_v9 }
  0x8e   : > { %v246_v14 = vadd.f32 %v238_v10, %v222_v11  ;;  %v247_v15 = vadd.f32 %v238_v10, %v223_v12  ;;  %v2005_v11 = vand.u32 4294901760, %v312_v59 }
  0x90   : > { %1680 = vtanh.f32 %v246_v14 }
  0x91   : > { %1682 = vtanh.f32 %v247_v15  ;;  %v284_v15 = vsel %vm276_vm0, %v258_v0, 0 }
  0x93   : > { %v204_v17 = vpop.permute.xlu0 %203  ;;  %v199_v20 = vpop.permute.xlu1 %198 }
  0x94   : > { %v220_v18 = vmul.f32 %v212_v7, %v204_v17  ;;  %v221_v19 = vmul.f32 %v213_v8, %v204_v17  ;;  %v218_v34 = vmul.f32 %v212_v7, %v199_v20  ;;  %v219_v35 = vmul.f32 %v213_v8, %v199_v20 }
  0x96   : > { %v1681_v22 = vpop.eup %1680  ;;  %v244_v23 = vadd.f32 %v234_v13, %v220_v18  ;;  %v245_v24 = vadd.f32 %v234_v13, %v221_v19  ;;  %v2022_v19 = vand.u32 4294901760, %v1996_v63 }
  0x97   : > { %v1683_v25 = vpop.eup %1682  ;;  %v1950_v26 = vand.u32 4294901760, %v1681_v22 }
  0x98   : > { %1684 = vtanh.f32 %v244_v23  ;;  %v1959_v30 = vand.u32 4294901760, %v1683_v25 }
  0x99   : > { %1686 = vtanh.f32 %v245_v24  ;;  %302 = vmatpush.msra.mxu0 %v1950_v26  ;;  %453 = vmatpush.msra.mxu3 %v1950_v26  ;;  %v1957_v29 = vsub.f32 %v1681_v22, %v1950_v26 }
  0x9a   : > { %v1971_v47 = vsub.f32 %v1683_v25, %v1959_v30  ;;  %v2030_v25 = vand.u32 4294901760, %v284_v15 }
  0x9b   : > { %409 = vmatpush.msra.mxu2 %v1957_v29  ;;  %v356_v36 = vand.u32 4294901760, %v1957_v29 }
  0x9c   : > { %v230_v38 = vpop.permute.xlu0 %229  ;;  %v226_v41 = vpop.permute.xlu1 %225  ;;  %v634_v56 = vand.u32 4294901760, %v1971_v47 }
  0x9d   : > { %v242_v39 = vadd.f32 %v230_v38, %v218_v34  ;;  %v243_v40 = vadd.f32 %v230_v38, %v219_v35  ;;  %v357_v42 = vsub.f32 %v1957_v29, %v356_v36  ;;  %v240_v45 = vadd.f32 %v226_v41, %v216_v31  ;;  %v259_v38 = vld [vmem:[#allocation2 + $0x18] sm:$0xff] }
  0x9e   : > { %v1685_v44 = vpop.eup %1684  ;;  %v241_v46 = vadd.f32 %v226_v41, %v217_v32  ;;  %v635_v7 = vsub.f32 %v1971_v47, %v634_v56  ;;  %v320_v35 = vsub.f32 %v1996_v63, %v2022_v19  ;;  %v2041_v41 = vsub.f32 %v284_v15, %v2030_v25 }
  0x9f   : > { %v1687_v48 = vpop.eup %1686  ;;  %1688 = vtanh.f32 %v242_v39  ;;  %v1973_v49 = vand.u32 4294901760, %v1685_v44  ;;  %v358_v50 = vand.u32 4294901760, %v357_v42  ;;  %v287_v43 = vsel %vm276_vm0, %v259_v38, 0 }
  0xa0   : > { %v1978_v53 = vand.u32 4294901760, %v1687_v48  ;;  %1690 = vtanh.f32 %v243_v40  ;;  %v636_v20 = vand.u32 4294901760, %v635_v7 }
  0xa1   : > { %1692 = vtanh.f32 %v240_v45  ;;  %304 = vmatpush.msra.mxu0 %v1973_v49  ;;  %359 = vmatpush.msra.mxu1 %v358_v50  ;;  %v361_v54 = vsub.f32 %v1685_v44, %v1973_v49  ;;  %v321_v45 = vand.u32 4294901760, %v320_v35 }
  0xa2   : > { %1694 = vtanh.f32 %v241_v46  ;;  %455 = vmatpush.msra.mxu3 %v1973_v49  ;;  %v1989_v57 = vsub.f32 %v1687_v48, %v1978_v53  ;;  %v2047_v46 = vand.u32 4294901760, %v2041_v41  ;;  %v2049_v48 = vand.u32 4294901760, %v287_v43 }
  0xa3   : > { %412 = vmatpush.msra.mxu2 %v361_v54  ;;  %v362_v58 = vand.u32 4294901760, %v361_v54 }
  0xa4   : > { %v640_v62 = vand.u32 4294901760, %v1989_v57  ;;  %v328_v50 = vsub.f32 %v2041_v41, %v2047_v46  ;;  %v334_v52 = vsub.f32 %v287_v43, %v2049_v48 }
  0xa5   : > { %v1689_v60 = vpop.eup %1688  ;;  %v363_v61 = vsub.f32 %v361_v54, %v362_v58 }
  0xa6   : > { %v1691_v1 = vpop.eup %1690  ;;  %v1998_v6 = vand.u32 4294901760, %v1689_v60  ;;  %v641_v17 = vsub.f32 %v1989_v57, %v640_v62 }
  0xa7   : > { %v1693_v8 = vpop.eup %1692  ;;  %v2003_v9 = vand.u32 4294901760, %v1691_v1  ;;  %v364_v10 = vand.u32 4294901760, %v363_v61 }
  0xa8   : > { %v1695_v12 = vpop.eup %1694  ;;  %306 = vmatpush.msra.mxu0 %v1998_v6  ;;  %457 = vmatpush.msra.mxu3 %v1998_v6  ;;  %v2009_v13 = vand.u32 4294901760, %v1693_v8  ;;  %v367_v14 = vsub.f32 %v1689_v60, %v1998_v6  ;;  %v642_v32 = vand.u32 4294901760, %v641_v17 }
  0xa9   : > { %v2013_v16 = vand.u32 4294901760, %v1695_v12  ;;  %365 = vmatpush.msra.mxu1 %v364_v10  ;;  %v2019_v18 = vsub.f32 %v1691_v1, %v2003_v9  ;;  %v2116_v10 = vpop.permute.xlu0 %261 }
  0xaa   : > { %308 = vmatpush.msra.mxu0 %v2009_v13  ;;  %415 = vmatpush.msra.mxu2 %v367_v14  ;;  %v373_v21 = vsub.f32 %v1693_v8, %v2009_v13  ;;  %v368_v22 = vand.u32 4294901760, %v367_v14 }
  0xab   : > { %459 = vmatpush.msra.mxu3 %v2009_v13  ;;  %314 = vmatmul.f32.vlgmr.msra.gmra.mxu0 %v2005_v11  ;;  %v646_v23 = vand.u32 4294901760, %v2019_v18  ;;  %v651_v24 = vsub.f32 %v1695_v12, %v2013_v16 }
  0xac   : > { %500 = vmatpush.msrb.mxu0 %v356_v36  ;;  %v369_v27 = vsub.f32 %v367_v14, %v368_v22  ;;  %v374_v31 = vand.u32 4294901760, %v373_v21  ;;  %418 = vmatpush.msra.mxu2 %v373_v21 }
  0xad   : > { %637 = vmatpush.msrb.mxu3 %v636_v20  ;;  %v647_v33 = vsub.f32 %v2019_v18, %v646_v23  ;;  %v652_v34 = vand.u32 4294901760, %v651_v24  ;;  %421 = vmatmul.f32.vlgmr.msra.gmra.mxu2 %v1964_v37 }
  0xae   : > { %463 = vmatmul.f32.vlgmr.msra.gmra.mxu3 %v1976_v51  ;;  %504 = vmatpush.msrb.mxu0 %v362_v58  ;;  %v370_v39 = vand.u32 4294901760, %v369_v27  ;;  %v375_v29 = vsub.f32 %v373_v21, %v374_v31 }
  0xaf   : > { %580 = vmatpush.msrb.mxu2 %v1959_v30  ;;  %643 = vmatpush.msrb.mxu3 %v642_v32  ;;  %v648_v36 = vand.u32 4294901760, %v647_v33  ;;  %v653_v40 = vsub.f32 %v651_v24, %v652_v34 }
  0xb0   : > { %508 = vmatpush.msrb.mxu0 %v368_v22  ;;  %371 = vmatpush.msra.mxu1 %v370_v39  ;;  %v376_v42 = vand.u32 4294901760, %v375_v29 }
  0xb1   : > { %582 = vmatpush.msrb.mxu2 %v1978_v53  ;;  %649 = vmatpush.msrb.mxu3 %v648_v36  ;;  %v654_v44 = vand.u32 4294901760, %v653_v40 }
  0xb2   : > { %512 = vmatpush.msrb.mxu0 %v374_v31  ;;  %377 = vmatpush.msra.mxu1 %v376_v42 }
  0xb3   : > { %584 = vmatpush.msrb.mxu2 %v2003_v9  ;;  %655 = vmatpush.msrb.mxu3 %v654_v44 }
  0xb4   : > { %687 = vmatpush.msra.mxu0 %v1971_v47  ;;  %379 = vmatmul.f32.vlgmr.msra.gmra.mxu1 %v1952_v28  ;;  %v335_v47 = vand.u32 4294901760, %v334_v52 }
  0xb5   : > { %322 = vmatmul.f32.gmra.mxu0 %v321_v45  ;;  %543 = vmatpush.msrb.mxu1 %v1950_v26  ;;  %v329_v26 = vand.u32 4294901760, %v328_v50  ;;  %v854_v50 = vld [vmem:[#allocation2 + $0x20] sm:$0xff] }
  0xb6   : > { %586 = vmatpush.msrb.mxu2 %v2013_v16  ;;  %821 = vmatpush.msra.mxu3 %v1959_v30 }
  0xb7   : > { %690 = vmatpush.msra.mxu0 %v1989_v57  ;;  %426 = vmatmul.f32.gmra.mxu2 %v1996_v63 }
  0xb8   : > { %778 = vmatpush.msra.mxu2 %v634_v56  ;;  %545 = vmatpush.msrb.mxu1 %v1973_v49  ;;  %v336_v49 = vsub.f32 %v334_v52, %v335_v47 }
  0xb9   : > { %823 = vmatpush.msra.mxu3 %v1978_v53  ;;  %693 = vmatpush.msra.mxu0 %v2019_v18 }
  0xba   : > { %782 = vmatpush.msra.mxu2 %v640_v62  ;;  %469 = vmatmul.f32.gmra.mxu3 %v2022_v19  ;;  %v337_v54 = vand.u32 4294901760, %v336_v49  ;;  %v875_v49 = vsel %vm276_vm0, %v854_v50, 0 }
  0xbb   : > { %547 = vmatpush.msrb.mxu1 %v1998_v6  ;;  %825 = vmatpush.msra.mxu3 %v2003_v9 }
  0xbc   : > { %696 = vmatpush.msra.mxu0 %v651_v24  ;;  %786 = vmatpush.msra.mxu2 %v646_v23 }
  0xbd   : > { %549 = vmatpush.msrb.mxu1 %v2009_v13  ;;  %827 = vmatpush.msra.mxu3 %v2013_v16 }
  0xbe   : > { %790 = vmatpush.msra.mxu2 %v652_v34  ;;  %330 = vmatmul.f32.gmra.mxu0 %v329_v26 }
  0xbf   : > { %731 = vmatpush.msra.mxu1 %v1959_v30  ;;  %431 = vmatmul.f32.gmra.mxu2 %v2041_v41 }
  0xc0   : > { %383 = vmatmul.f32.gmra.mxu1 %v1984_v55 }
  0xc1   : > { %733 = vmatpush.msra.mxu1 %v1978_v53 }
  0xc2   : > { %475 = vmatmul.f32.gmra.mxu3 %v2047_v46 }
  0xc3   : > { %735 = vmatpush.msra.mxu1 %v2003_v9  ;;  %v2114_v9 = vpop.permute.xlu1 %269 }
  0xc5   : > { %737 = vmatpush.msra.mxu1 %v2013_v16 }
  0xc6   : > { %338 = vmatmul.f32.gmra.mxu0 %v337_v54 }
  0xc7   : > { %436 = vmatmul.f32.gmra.mxu2 %v334_v52 }
  0xc8   : > { %387 = vmatmul.f32.gmra.mxu1 %v2030_v25 }
  0xca   : > { %481 = vmatmul.f32.gmra.mxu3 %v335_v47 }
  0xce   : > { %514 = vmatmul.f32.vlgmr.msrb.gmra.mxu0 %v1952_v28 }
  0xcf   : > { %592 = vmatmul.f32.vlgmr.msrb.gmra.mxu2 %v2005_v11 }
  0xd0   : > { %391 = vmatmul.f32.gmra.mxu1 %v2049_v48 }
  0xd2   : > { %657 = vmatmul.f32.vlgmr.msrb.gmra.mxu3 %v1952_v28 }
  0xd6   : > { %518 = vmatmul.f32.gmra.mxu0 %v1984_v55 }
  0xd7   : > { %600 = vmatmul.f32.gmra.mxu2 %v321_v45 }
  0xd8   : > { %551 = vmatmul.f32.vlgmr.msrb.gmra.mxu1 %v1952_v28 }
  0xda   : > { %661 = vmatmul.f32.gmra.mxu3 %v1984_v55 }
  0xde   : > { %522 = vmatmul.f32.gmra.mxu0 %v2030_v25 }
  0xdf   : > { %608 = vmatmul.f32.gmra.mxu2 %v329_v26 }
  0xe0   : > { %555 = vmatmul.f32.gmra.mxu1 %v1984_v55 }
  0xe2   : > { %665 = vmatmul.f32.gmra.mxu3 %v2030_v25 }
  0xe6   : > { %526 = vmatmul.f32.gmra.mxu0 %v2049_v48 }
  0xe7   : > { %616 = vmatmul.f32.gmra.mxu2 %v337_v54 }
  0xe8   : > { %559 = vmatmul.f32.gmra.mxu1 %v2030_v25 }
  0xea   : > { %669 = vmatmul.f32.gmra.mxu3 %v2049_v48 }
  0xee   : > { %699 = vmatmul.f32.vlgmr.msra.gmra.mxu0 %v1964_v37 }
  0xef   : > { %792 = vmatmul.f32.vlgmr.msra.gmra.mxu2 %v1952_v28 }
  0xf0   : > { %563 = vmatmul.f32.gmra.mxu1 %v2049_v48 }
  0xf2   : > { %829 = vmatmul.f32.vlgmr.msra.gmra.mxu3 %v1952_v28 }
  0xf6   : > { %704 = vmatmul.f32.gmra.mxu0 %v1996_v63  ;;  %v2110_v63 = vpop.permute.xlu2 %273 }
  0xf7   : > { %796 = vmatmul.f32.gmra.mxu2 %v1984_v55 }
  0xf8   : > { %741 = vmatmul.f32.vlgmr.msra.gmra.mxu1 %v1976_v51 }
  0xfa   : > { %833 = vmatmul.f32.gmra.mxu3 %v1984_v55 }
  0xfe   : > { %709 = vmatmul.f32.gmra.mxu0 %v2041_v41  ;;  %v2112_v8 = vpop.permute.xlu2 %265 }
  0xff   : > { %800 = vmatmul.f32.gmra.mxu2 %v2030_v25 }
 0x100   : > { %747 = vmatmul.f32.gmra.mxu1 %v2022_v19 }
 0x102   : > { %837 = vmatmul.f32.gmra.mxu3 %v2030_v25 }
 0x106   : > { %714 = vmatmul.f32.gmra.mxu0 %v334_v52 }
 0x107   : > { %804 = vmatmul.f32.gmra.mxu2 %v2049_v48 }
 0x108   : > { %753 = vmatmul.f32.gmra.mxu1 %v2047_v46 }
 0x10a   : > { %841 = vmatmul.f32.gmra.mxu3 %v2049_v48 }
 0x110   : > { %759 = vmatmul.f32.gmra.mxu1 %v335_v47 }
 0x128   : > { %v315_v28 = vpop.f32.mrf.mxu0 }
 0x129   : > { %v316_v17 = vadd.f32 %v315_v28, %v2116_v10 }
 0x130   : > { %v422_v30 = vpop.f32.mrf.mxu2 }
 0x131   : > { %v380_v51 = vpop.f32.mrf.mxu1  ;;  %v464_v53 = vpop.f32.mrf.mxu3 }
 0x132   : > { %v323_v37 = vpop.f32.mrf.mxu0  ;;  %v381_v20 = vadd.f32 %v380_v51, %v316_v17 }
 0x133   : > { %v324_v14 = vadd.f32 %v323_v37, %v2112_v8 }
 0x134   : > { %v423_v32 = vadd.f32 %v422_v30, %v381_v20 }
 0x136   : > { %v465_v38 = vadd.f32 %v464_v53, %v423_v32  ;;  %v2139_v53 = vand.u32 4294901760, %v875_v49 }
 0x13a   : > { %v427_v55 = vpop.f32.mrf.mxu2 }
 0x13b   : > { %v331_v56 = vpop.f32.mrf.mxu0 }
 0x13c   : > { %v332_v15 = vadd.f32 %v331_v56, %v2114_v9  ;;  %v855_v56 = vld [vmem:[#allocation2 + $0x28] sm:$0xff] }
 0x13d   : > { %v384_v57 = vpop.f32.mrf.mxu1  ;;  %v470_v58 = vpop.f32.mrf.mxu3 }
 0x13e   : > { %v385_v18 = vadd.f32 %v384_v57, %v324_v14 }
 0x140   : > { %v428_v24 = vadd.f32 %v427_v55, %v385_v18 }
 0x142   : > { %v432_v59 = vpop.f32.mrf.mxu2  ;;  %v471_v33 = vadd.f32 %v470_v58, %v428_v24 }
 0x143   : > { %v339_v60 = vpop.f32.mrf.mxu0 }
 0x144   : > { %v340_v25 = vadd.f32 %v339_v60, %v2110_v63  ;;  %v2146_v60 = vsub.f32 %v875_v49, %v2139_v53 }
 0x145   : > { %v388_v61 = vpop.f32.mrf.mxu1  ;;  %v476_v62 = vpop.f32.mrf.mxu3 }
 0x146   : > { %v389_v19 = vadd.f32 %v388_v61, %v332_v15  ;;  %v878_v61 = vsel %vm276_vm0, %v855_v56, 0  ;;  %v2164_v18 = vand.u32 4294901760, %v2146_v60 }
 0x147   : > { %v2158_v14 = vand.u32 4294901760, %v878_v61 }
 0x148   : > { %v433_v27 = vadd.f32 %v432_v59, %v389_v19 }
 0x14a   : > { %v437_v0 = vpop.f32.mrf.mxu2  ;;  %v477_v34 = vadd.f32 %v476_v62, %v433_v27  ;;  %v1832_v27 = vmov 3  }
 0x14b   : > { %v515_v6 = vpop.f32.mrf.mxu0  ;;  %1673 = vset.pattern.permute.xlu1 %v1832_v27  ;;  %1674 = vset.pattern.permute.xlu2 %v1832_v27 }
 0x14c   : > { %v516_v43 = vadd.f32 %v515_v6, %v465_v38  ;;  %859 = vperm.xlu1 %1673, %v1936_v5   ;;  %863 = vperm.xlu2 %1674, %v1929_v4  }
 0x14d   : > { %v392_v1 = vpop.f32.mrf.mxu1  ;;  %v482_v7 = vpop.f32.mrf.mxu3 }
 0x14e   : > { %v393_v35 = vadd.f32 %v392_v1, %v340_v25  ;;  %v2174_v25 = vsub.f32 %v878_v61, %v2158_v14 }
 0x150   : > { %v438_v42 = vadd.f32 %v437_v0, %v393_v35 }
 0x152   : > { %v2118_v11 = vpop.f32.mrf.mxu2  ;;  %v483_v52 = vadd.f32 %v482_v7, %v438_v42 }
 0x153   : > { %v519_v12 = vpop.f32.mrf.mxu0 }
 0x154   : > { %v520_v39 = vadd.f32 %v519_v12, %v471_v33  ;;  %867 = vperm.xlu1 %1673, %v1923_v3   ;;  %871 = vperm.xlu2 %1674, %v1916_v2  }
 0x155   : > { %v552_v13 = vpop.f32.mrf.mxu1  ;;  %v2122_v16 = vpop.f32.mrf.mxu3 }
 0x156   : > { %v553_v48 = vadd.f32 %v552_v13, %v516_v43 }
 0x15a   : > { %v601_v21 = vpop.f32.mrf.mxu2 }
 0x15b   : > { %v523_v22 = vpop.f32.mrf.mxu0  ;;  %v602_v24 = vadd.f32 %v601_v21, %v2112_v8  ;;  %v594_v8 = vadd.f32 %v2118_v11, %v2116_v10 }
 0x15c   : > { %v524_v29 = vadd.f32 %v523_v22, %v477_v34  ;;  %v909_v34 = vsub.f32 %v2146_v60, %v2164_v18 }
 0x15d   : > { %v556_v23 = vpop.f32.mrf.mxu1  ;;  %v2126_v31 = vpop.f32.mrf.mxu3 }
 0x15e   : > { %v557_v44 = vadd.f32 %v556_v23, %v520_v39  ;;  %v856_v23 = vld [vmem:[#allocation2 + $0x30] sm:$0xff] }
 0x15f   : > { %v881_v38 = vsel %vm276_vm0, %v856_v23, 0 }
 0x162   : > { %v2128_v36 = vpop.f32.mrf.mxu2 }
 0x163   : > { %v527_v40 = vpop.f32.mrf.mxu0  ;;  %v610_v42 = vadd.f32 %v2128_v36, %v2114_v9  ;;  %v659_v9 = vadd.f32 %v2122_v16, %v594_v8 }
 0x164   : > { %v528_v26 = vadd.f32 %v527_v40, %v483_v52 }
 0x165   : > { %v560_v41 = vpop.f32.mrf.mxu1  ;;  %v2130_v46 = vpop.f32.mrf.mxu3 }
 0x166   : > { %v561_v45 = vadd.f32 %v560_v41, %v524_v29  ;;  %v663_v41 = vadd.f32 %v2126_v31, %v602_v24  ;;  %v2197_v31 = vand.u32 4294901760, %v881_v38  ;;  %v667_v49 = vadd.f32 %v2130_v46, %v610_v42 }
 0x168   : > { %1696 = vtanh.f32 %v561_v45 }
 0x169   : > { %1698 = vtanh.f32 %v557_v44  ;;  %v2191_v44 = vand.u32 4294901760, %v2174_v25 }
 0x16a   : > { %1700 = vtanh.f32 %v553_v48  ;;  %v2132_v47 = vpop.f32.mrf.mxu2  ;;  %v2195_v48 = vand.u32 4294901760, %v909_v34 }
 0x16b   : > { %v2135_v28 = vpop.f32.mrf.mxu0 }
 0x16d   : > { %v564_v54 = vpop.f32.mrf.mxu1  ;;  %v2137_v51 = vpop.f32.mrf.mxu3 }
 0x16e   : > { %v1697_v30 = vpop.eup %1696  ;;  %v565_v37 = vadd.f32 %v564_v54, %v528_v26  ;;  %v857_v26 = vld [vmem:[#allocation2 + $0x38] sm:$0xff]  ;;  %v917_v54 = vsub.f32 %v2174_v25, %v2191_v44 }
 0x16f   : > { %v1699_v55 = vpop.eup %1698  ;;  %v2141_v57 = vand.u32 4294901760, %v1697_v30  ;;  %v884_v46 = vsel %vm276_vm0, %v857_v26, 0 }
 0x170   : > { %1702 = vtanh.f32 %v565_v37  ;;  %v1701_v58 = vpop.eup %1700  ;;  %v2143_v59 = vand.u32 4294901760, %v1699_v55 }
 0x171   : > { %v958_v6 = vsub.f32 %v1697_v30, %v2141_v57  ;;  %v2154_v7 = vand.u32 4294901760, %v1701_v58  ;;  %v701_v30 = vadd.f32 %v2135_v28, %v659_v9 }
 0x172   : > { %v2149_v62 = vpop.f32.mrf.mxu2  ;;  %v964_v17 = vsub.f32 %v1699_v55, %v2143_v59  ;;  %v2210_v55 = vsub.f32 %v881_v38, %v2197_v31 }
 0x173   : > { %v705_v0 = vpop.f32.mrf.mxu0  ;;  %v2170_v20 = vsub.f32 %v1701_v58, %v2154_v7  ;;  %v959_v22 = vand.u32 4294901760, %v958_v6 }
 0x174   : > { %v965_v33 = vand.u32 4294901760, %v964_v17  ;;  %v706_v36 = vadd.f32 %v705_v0, %v663_v41 }
 0x175   : > { %v2151_v1 = vpop.f32.mrf.mxu1  ;;  %v2156_v13 = vpop.f32.mrf.mxu3  ;;  %v960_v29 = vsub.f32 %v958_v6, %v959_v22  ;;  %v971_v40 = vand.u32 4294901760, %v2170_v20 }
 0x176   : > { %v1703_v12 = vpop.eup %1702  ;;  %v966_v45 = vsub.f32 %v964_v17, %v965_v33  ;;  %v743_v61 = vadd.f32 %v2151_v1, %v701_v30  ;;  %v2224_v1 = vand.u32 4294901760, %v884_v46 }
 0x177   : > { %v2160_v15 = vand.u32 4294901760, %v1703_v12  ;;  %v961_v50 = vand.u32 4294901760, %v960_v29  ;;  %v972_v52 = vsub.f32 %v2170_v20, %v971_v40 }
 0x178   : > { %v967_v16 = vand.u32 4294901760, %v966_v45  ;;  %v794_v24 = vadd.f32 %v2149_v62, %v743_v61  ;;  %v2236_v34 = vsub.f32 %v884_v46, %v2224_v1 }
 0x179   : > { %899 = vmatpush.msrb.mxu0 %v2160_v15  ;;  %1050 = vmatpush.msrb.mxu3 %v2160_v15  ;;  %v952_v19 = vsub.f32 %v1703_v12, %v2160_v15  ;;  %v973_v28 = vand.u32 4294901760, %v972_v52 }
 0x17a   : > { %v797_v35 = vpop.f32.mrf.mxu2 }
 0x17b   : > { %901 = vmatpush.msrb.mxu0 %v2141_v57  ;;  %1006 = vmatpush.msrb.mxu2 %v952_v19  ;;  %v953_v32 = vand.u32 4294901760, %v952_v19  ;;  %v710_v10 = vpop.f32.mrf.mxu0 }
 0x17c   : > { %1052 = vmatpush.msrb.mxu3 %v2141_v57  ;;  %v711_v56 = vadd.f32 %v710_v10, %v667_v49  ;;  %v1833_v49 = vmov 4  }
 0x17d   : > { %v748_v21 = vpop.f32.mrf.mxu1  ;;  %903 = vmatpush.msrb.mxu0 %v2143_v59  ;;  %1009 = vmatpush.msrb.mxu2 %v958_v6  ;;  %v954_v39 = vsub.f32 %v952_v19, %v953_v32  ;;  %v834_v43 = vpop.f32.mrf.mxu3  ;;  %v618_v6 = vadd.f32 %v2132_v47, %v2110_v63 }
 0x17e   : > { %1054 = vmatpush.msrb.mxu3 %v2143_v59  ;;  %v749_v37 = vadd.f32 %v748_v21, %v706_v36  ;;  %v2245_v21 = vand.u32 4294901760, %v2236_v34  ;;  %1675 = vset.pattern.permute.xlu0 %v1833_v49 }
 0x17f   : > { %905 = vmatpush.msrb.mxu0 %v2154_v7  ;;  %1012 = vmatpush.msrb.mxu2 %v964_v17  ;;  %v955_v11 = vand.u32 4294901760, %v954_v39  ;;  %v671_v47 = vadd.f32 %v2137_v51, %v618_v6  ;;  %v831_v51 = vadd.f32 %v2156_v13, %v794_v24 }
 0x180   : > { %1056 = vmatpush.msrb.mxu3 %v2154_v7  ;;  %911 = vmatmul.f32.vlgmr.msrb.gmra.mxu0 %v2195_v48  ;;  %v798_v19 = vadd.f32 %v797_v35, %v749_v37 }
 0x181   : > { %1097 = vmatpush.msra.mxu0 %v953_v32  ;;  %956 = vmatpush.msrb.mxu1 %v955_v11 }
 0x182   : > { %1015 = vmatpush.msrb.mxu2 %v2170_v20  ;;  %v801_v58 = vpop.f32.mrf.mxu2  ;;  %1060 = vmatmul.f32.vlgmr.msrb.gmra.mxu3 %v2164_v18  ;;  %v2219_v20 = vand.u32 4294901760, %v917_v54  ;;  %v835_v32 = vadd.f32 %v834_v43, %v798_v19 }
 0x183   : > { %1101 = vmatpush.msra.mxu0 %v959_v22  ;;  %1018 = vmatmul.f32.vlgmr.msrb.gmra.mxu2 %v2146_v60  ;;  %v2222_v22 = vand.u32 4294901760, %v2210_v55  ;;  %v715_v63 = vpop.f32.mrf.mxu0 }
 0x184   : > { %962 = vmatpush.msrb.mxu1 %v961_v50  ;;  %v716_v62 = vadd.f32 %v715_v63, %v671_v47  ;;  %1676 = vset.pattern.permute.xlu1 %v1833_v49 }
 0x185   : > { %1105 = vmatpush.msra.mxu0 %v965_v33  ;;  %v754_v0 = vpop.f32.mrf.mxu1  ;;  %v838_v17 = vpop.f32.mrf.mxu3  ;;  %v925_v33 = vsub.f32 %v2210_v55, %v2222_v22  ;;  %1451 = vperm.xlu0 %1675, %v1936_v5  }
 0x186   : > { %968 = vmatpush.msrb.mxu1 %v967_v16  ;;  %v755_v12 = vadd.f32 %v754_v0, %v711_v56  ;;  %1455 = vperm.xlu1 %1676, %v1929_v4  }
 0x187   : > { %1109 = vmatpush.msra.mxu0 %v971_v40  ;;  %v2242_v8 = vand.u32 4294901760, %v925_v33  ;;  %1677 = vset.pattern.permute.xlu2 %v1833_v49 }
 0x188   : > { %974 = vmatpush.msrb.mxu1 %v973_v28  ;;  %v802_v23 = vadd.f32 %v801_v58, %v755_v12  ;;  %919 = vmatmul.f32.gmra.mxu0 %v2219_v20 }
 0x189   : > { %976 = vmatmul.f32.vlgmr.msrb.gmra.mxu1 %v2139_v53  ;;  %1459 = vperm.xlu2 %1677, %v1923_v3  }
 0x18a   : > { %1140 = vmatpush.msra.mxu1 %v2160_v15  ;;  %v839_v27 = vadd.f32 %v838_v17, %v802_v23  ;;  %1066 = vmatmul.f32.gmra.mxu3 %v2191_v44  ;;  %v805_v35 = vpop.f32.mrf.mxu2 }
 0x18b   : > { %1023 = vmatmul.f32.gmra.mxu2 %v2174_v25 }
 0x18c   : > { %1142 = vmatpush.msra.mxu1 %v2141_v57  ;;  %1704 = vtanh.f32 %v839_v27 }
 0x18d   : > { %v760_v15 = vpop.f32.mrf.mxu1  ;;  %1706 = vtanh.f32 %v835_v32  ;;  %v842_v57 = vpop.f32.mrf.mxu3 }
 0x18e   : > { %1144 = vmatpush.msra.mxu1 %v2143_v59  ;;  %v761_v38 = vadd.f32 %v760_v15, %v716_v62  ;;  %1708 = vtanh.f32 %v831_v51  ;;  %v933_v59 = vsub.f32 %v2236_v34, %v2245_v21  ;;  %1463 = vperm.xlu1 %1676, %v1916_v2   ;;  %v1834_v2 = vmov 5  }
 0x18f   : > { %1679 = vset.pattern.permute.xlu0 %v1834_v2 }
 0x190   : > { %1146 = vmatpush.msra.mxu1 %v2154_v7  ;;  %v806_v39 = vadd.f32 %v805_v35, %v761_v38  ;;  %927 = vmatmul.f32.gmra.mxu0 %v2242_v8  ;;  %v2253_v42 = vand.u32 4294901760, %v933_v59 }
 0x191   : > { %980 = vmatmul.f32.gmra.mxu1 %v2158_v14  ;;  %1678 = vset.pattern.permute.xlu2 %v1834_v2 }
 0x192   : > { %v1705_v29 = vpop.eup %1704  ;;  %v843_v13 = vadd.f32 %v842_v57, %v806_v39  ;;  %1072 = vmatmul.f32.gmra.mxu3 %v2222_v22  ;;  %1493 = vperm.xlu2 %1678, %v1936_v5  }
 0x193   : > { %1028 = vmatmul.f32.gmra.mxu2 %v2210_v55  ;;  %v1707_v7 = vpop.eup %1706  ;;  %v1178_v40 = vand.u32 4294901760, %v1705_v29 }
 0x194   : > { %1710 = vtanh.f32 %v843_v13  ;;  %v1709_v41 = vpop.eup %1708  ;;  %v1180_v43 = vand.u32 4294901760, %v1707_v7 }
 0x195   : > { %v1236_v10 = vsub.f32 %v1705_v29, %v1178_v40  ;;  %v1182_v45 = vand.u32 4294901760, %v1709_v41 }
 0x196   : > { %v1242_v36 = vsub.f32 %v1707_v7, %v1180_v43 }
 0x197   : > { %v1237_v52 = vand.u32 4294901760, %v1236_v10  ;;  %v1248_v26 = vsub.f32 %v1709_v41, %v1182_v45 }
 0x198   : > { %935 = vmatmul.f32.gmra.mxu0 %v2253_v42  ;;  %v1243_v30 = vand.u32 4294901760, %v1242_v36 }
 0x199   : > { %984 = vmatmul.f32.gmra.mxu1 %v2197_v31  ;;  %v1238_v16 = vsub.f32 %v1236_v10, %v1237_v52  ;;  %v1249_v56 = vand.u32 4294901760, %v1248_v26 }
 0x19a   : > { %v1711_v11 = vpop.eup %1710  ;;  %1078 = vmatmul.f32.gmra.mxu3 %v2245_v21  ;;  %v1244_v46 = vsub.f32 %v1242_v36, %v1243_v30 }
 0x19b   : > { %1033 = vmatmul.f32.gmra.mxu2 %v2236_v34  ;;  %v1176_v9 = vand.u32 4294901760, %v1711_v11  ;;  %v1239_v61 = vand.u32 4294901760, %v1238_v16  ;;  %v1250_v0 = vsub.f32 %v1248_v26, %v1249_v56 }
 0x19c   : > { %v1245_v28 = vand.u32 4294901760, %v1244_v46 }
 0x19d   : > { %1177 = vmatpush.msra.mxu2 %v1176_v9  ;;  %1328 = vmatpush.msrb.mxu1 %v1176_v9  ;;  %v1230_v50 = vsub.f32 %v1711_v11, %v1176_v9  ;;  %v1251_v6 = vand.u32 4294901760, %v1250_v0 }
 0x19f   : > { %1179 = vmatpush.msra.mxu2 %v1178_v40  ;;  %1284 = vmatpush.msrb.mxu0 %v1230_v50  ;;  %v1231_v54 = vand.u32 4294901760, %v1230_v50 }
 0x1a0   : > { %1330 = vmatpush.msrb.mxu1 %v1178_v40  ;;  %1111 = vmatmul.f32.vlgmr.msra.gmra.mxu0 %v2139_v53 }
 0x1a1   : > { %988 = vmatmul.f32.gmra.mxu1 %v2224_v1  ;;  %1181 = vmatpush.msra.mxu2 %v1180_v43  ;;  %v1232_v37 = vsub.f32 %v1230_v50, %v1231_v54 }
 0x1a2   : > { %1287 = vmatpush.msrb.mxu0 %v1236_v10  ;;  %1332 = vmatpush.msrb.mxu1 %v1180_v43 }
 0x1a3   : > { %1183 = vmatpush.msra.mxu2 %v1182_v45  ;;  %v1233_v58 = vand.u32 4294901760, %v1232_v37 }
 0x1a4   : > { %1290 = vmatpush.msrb.mxu0 %v1242_v36  ;;  %1334 = vmatpush.msrb.mxu1 %v1182_v45 }
 0x1a5   : > { %1375 = vmatpush.msrb.mxu2 %v1231_v54  ;;  %1234 = vmatpush.msra.mxu3 %v1233_v58 }
 0x1a6   : > { %1293 = vmatpush.msrb.mxu0 %v1248_v26  ;;  %1189 = vmatmul.f32.vlgmr.msra.gmra.mxu2 %v2195_v48 }
 0x1a7   : > { %1379 = vmatpush.msrb.mxu2 %v1237_v52  ;;  %1240 = vmatpush.msra.mxu3 %v1239_v61 }
 0x1a8   : > { %1115 = vmatmul.f32.gmra.mxu0 %v2158_v14 }
 0x1a9   : > { %1148 = vmatmul.f32.vlgmr.msra.gmra.mxu1 %v2139_v53  ;;  %1383 = vmatpush.msrb.mxu2 %v1243_v30 }
 0x1aa   : > { %1246 = vmatpush.msra.mxu3 %v1245_v28 }
 0x1ab   : > { %1387 = vmatpush.msrb.mxu2 %v1249_v56 }
 0x1ac   : > { %1252 = vmatpush.msra.mxu3 %v1251_v6 }
 0x1ad   : > { %1254 = vmatmul.f32.vlgmr.msra.gmra.mxu3 %v2139_v53 }
 0x1ae   : > { %1418 = vmatpush.msrb.mxu3 %v1176_v9  ;;  %1197 = vmatmul.f32.gmra.mxu2 %v2219_v20 }
 0x1b0   : > { %1420 = vmatpush.msrb.mxu3 %v1178_v40  ;;  %1119 = vmatmul.f32.gmra.mxu0 %v2197_v31 }
 0x1b1   : > { %1152 = vmatmul.f32.gmra.mxu1 %v2158_v14 }
 0x1b2   : > { %1422 = vmatpush.msrb.mxu3 %v1180_v43 }
 0x1b4   : > { %1424 = vmatpush.msrb.mxu3 %v1182_v45 }
 0x1b5   : > { %1258 = vmatmul.f32.gmra.mxu3 %v2158_v14 }
 0x1b6   : > { %1205 = vmatmul.f32.gmra.mxu2 %v2242_v8 }
 0x1b8   : > { %1123 = vmatmul.f32.gmra.mxu0 %v2224_v1 }
 0x1b9   : > { %1156 = vmatmul.f32.gmra.mxu1 %v2197_v31 }
 0x1bd   : > { %1262 = vmatmul.f32.gmra.mxu3 %v2197_v31 }
 0x1be   : > { %1213 = vmatmul.f32.gmra.mxu2 %v2253_v42  ;;  %v2297_v3 = vpop.permute.xlu1 %859 }
 0x1c0   : > { %1296 = vmatmul.f32.vlgmr.msrb.gmra.mxu0 %v2146_v60 }
 0x1c1   : > { %1160 = vmatmul.f32.gmra.mxu1 %v2224_v1 }
 0x1c5   : > { %1266 = vmatmul.f32.gmra.mxu3 %v2224_v1 }
 0x1c6   : > { %1389 = vmatmul.f32.vlgmr.msrb.gmra.mxu2 %v2139_v53 }
 0x1c8   : > { %1301 = vmatmul.f32.gmra.mxu0 %v2174_v25  ;;  %v2300_v25 = vpop.permute.xlu2 %863 }
 0x1c9   : > { %1338 = vmatmul.f32.vlgmr.msrb.gmra.mxu1 %v2164_v18 }
 0x1cd   : > { %1426 = vmatmul.f32.vlgmr.msrb.gmra.mxu3 %v2139_v53 }
 0x1ce   : > { %1393 = vmatmul.f32.gmra.mxu2 %v2158_v14 }
 0x1d0   : > { %1306 = vmatmul.f32.gmra.mxu0 %v2210_v55  ;;  %v872_v10 = vpop.permute.xlu2 %871 }
 0x1d1   : > { %1344 = vmatmul.f32.gmra.mxu1 %v2191_v44 }
 0x1d5   : > { %1430 = vmatmul.f32.gmra.mxu3 %v2158_v14 }
 0x1d6   : > { %1397 = vmatmul.f32.gmra.mxu2 %v2197_v31 }
 0x1d8   : > { %1311 = vmatmul.f32.gmra.mxu0 %v2236_v34 }
 0x1d9   : > { %1350 = vmatmul.f32.gmra.mxu1 %v2222_v22  ;;  %v2303_v22 = vpop.permute.xlu1 %867 }
 0x1dd   : > { %1434 = vmatmul.f32.gmra.mxu3 %v2197_v31 }
 0x1de   : > { %1401 = vmatmul.f32.gmra.mxu2 %v2224_v1 }
 0x1e1   : > { %1356 = vmatmul.f32.gmra.mxu1 %v2245_v21 }
 0x1e3   : > { %v2312_v58 = vpop.permute.xlu2 %1459 }
 0x1e5   : > { %1438 = vmatmul.f32.gmra.mxu3 %v2224_v1 }
 0x1f7   : > { %v2306_v9 = vpop.permute.xlu0 %1451 }
 0x1f8   : > { %v2308_v36 = vpop.permute.xlu1 %1455 }
 0x1fd   : > { %v912_v4 = vpop.f32.mrf.mxu0 }
 0x1fe   : > { %v913_v5 = vadd.f32 %v912_v4, %v2297_v3 }
 0x205   : > { %v1061_v18 = vpop.f32.mrf.mxu3  ;;  %v920_v44 = vpop.f32.mrf.mxu0 }
 0x206   : > { %v977_v53 = vpop.f32.mrf.mxu1  ;;  %v1019_v60 = vpop.f32.mrf.mxu2  ;;  %v921_v31 = vadd.f32 %v920_v44, %v2300_v25 }
 0x207   : > { %v978_v14 = vadd.f32 %v977_v53, %v913_v5 }
 0x209   : > { %v1020_v48 = vadd.f32 %v1019_v60, %v978_v14 }
 0x20b   : > { %v1062_v55 = vadd.f32 %v1061_v18, %v1020_v48 }
 0x20d   : > { %v1067_v20 = vpop.f32.mrf.mxu3  ;;  %v928_v1 = vpop.f32.mrf.mxu0 }
 0x20e   : > { %v981_v12 = vpop.f32.mrf.mxu1  ;;  %v1024_v17 = vpop.f32.mrf.mxu2  ;;  %v929_v24 = vadd.f32 %v928_v1, %v2303_v22 }
 0x20f   : > { %v982_v19 = vadd.f32 %v981_v12, %v921_v31 }
 0x211   : > { %v1025_v23 = vadd.f32 %v1024_v17, %v982_v19 }
 0x213   : > { %v1068_v63 = vadd.f32 %v1067_v20, %v1025_v23 }
 0x215   : > { %v1073_v33 = vpop.f32.mrf.mxu3  ;;  %v936_v34 = vpop.f32.mrf.mxu0 }
 0x216   : > { %v985_v47 = vpop.f32.mrf.mxu1  ;;  %v1029_v27 = vpop.f32.mrf.mxu2  ;;  %v937_v53 = vadd.f32 %v936_v34, %v872_v10 }
 0x217   : > { %v986_v32 = vadd.f32 %v985_v47, %v929_v24 }
 0x219   : > { %v1030_v62 = vadd.f32 %v1029_v27, %v986_v32 }
 0x21b   : > { %v1074_v51 = vadd.f32 %v1073_v33, %v1030_v62 }
 0x21d   : > { %v1112_v38 = vpop.f32.mrf.mxu0  ;;  %v1079_v8 = vpop.f32.mrf.mxu3 }
 0x21e   : > { %v989_v15 = vpop.f32.mrf.mxu1  ;;  %v1034_v35 = vpop.f32.mrf.mxu2  ;;  %v1113_v39 = vadd.f32 %v1112_v38, %v1062_v55 }
 0x21f   : > { %v990_v44 = vadd.f32 %v989_v15, %v937_v53 }
 0x221   : > { %v1035_v31 = vadd.f32 %v1034_v35, %v990_v44 }
 0x223   : > { %v1080_v20 = vadd.f32 %v1079_v8, %v1035_v31 }
 0x225   : > { %v1116_v21 = vpop.f32.mrf.mxu0 }
 0x226   : > { %v1149_v57 = vpop.f32.mrf.mxu1  ;;  %v1117_v59 = vadd.f32 %v1116_v21, %v1068_v63 }
 0x227   : > { %v1150_v13 = vadd.f32 %v1149_v57, %v1113_v39 }
 0x229   : > { %v1190_v29 = vpop.f32.mrf.mxu2  ;;  %1712 = vtanh.f32 %v1150_v13 }
 0x22a   : > { %v1191_v19 = vadd.f32 %v1190_v29, %v2297_v3 }
 0x22d   : > { %v1120_v42 = vpop.f32.mrf.mxu0 }
 0x22e   : > { %v1153_v7 = vpop.f32.mrf.mxu1  ;;  %v1121_v45 = vadd.f32 %v1120_v42, %v1074_v51  ;;  %v1464_v42 = vpop.permute.xlu1 %1463 }
 0x22f   : > { %v1154_v40 = vadd.f32 %v1153_v7, %v1117_v59  ;;  %v1713_v11 = vpop.eup %1712 }
 0x230   : > { %v1255_v41 = vpop.f32.mrf.mxu3  ;;  %v1466_v49 = vmul.f32 %v1713_v11, %v2306_v9 }
 0x231   : > { %1714 = vtanh.f32 %v1154_v40  ;;  %v1198_v43 = vpop.f32.mrf.mxu2  ;;  %v1256_v47 = vadd.f32 %v1255_v41, %v1191_v19 }
 0x232   : > { %v1199_v12 = vadd.f32 %v1198_v43, %v2300_v25 }
 0x235   : > { %v1124_v37 = vpop.f32.mrf.mxu0 }
 0x236   : > { %v1157_v50 = vpop.f32.mrf.mxu1  ;;  %v1125_v63 = vadd.f32 %v1124_v37, %v1080_v20 }
 0x237   : > { %v1715_v52 = vpop.eup %1714  ;;  %v1158_v26 = vadd.f32 %v1157_v50, %v1121_v45 }
 0x238   : > { %v1468_v54 = vmul.f32 %v1715_v52, %v2308_v36  ;;  %v1259_v30 = vpop.f32.mrf.mxu3 }
 0x239   : > { %1716 = vtanh.f32 %v1158_v26  ;;  %v1206_v16 = vpop.f32.mrf.mxu2  ;;  %v1260_v24 = vadd.f32 %v1259_v30, %v1199_v12  ;;  %v1504_v12 = vlaneseq }
 0x23a   : > { %v1474_v56 = vadd.f32 %v1468_v54, %v1466_v49  ;;  %v1207_v1 = vadd.f32 %v1206_v16, %v2303_v22 }
 0x23b   : > { %vm1506_vm2 = vcmp.lt.s32.totalorder %v1504_v12, 256 }
 0x23d   : > { %v1297_v6 = vpop.f32.mrf.mxu0 }
 0x23e   : > { %v1161_v46 = vpop.f32.mrf.mxu1  ;;  %v1298_v62 = vadd.f32 %v1297_v6, %v1256_v47 }
 0x23f   : > { %v1717_v61 = vpop.eup %1716  ;;  %v1162_v32 = vadd.f32 %v1161_v46, %v1125_v63 }
 0x240   : > { %v1470_v0 = vmul.f32 %v1717_v61, %v2312_v58  ;;  %v1263_v28 = vpop.f32.mrf.mxu3 }
 0x241   : > { %v1214_v2 = vpop.f32.mrf.mxu2  ;;  %v1264_v33 = vadd.f32 %v1263_v28, %v1207_v1  ;;  %1718 = vtanh.f32 %v1162_v32 }
 0x242   : > { %v1475_v4 = vadd.f32 %v1474_v56, %v1470_v0  ;;  %v1215_v57 = vadd.f32 %v1214_v2, %v872_v10 }
 0x245   : > { %v1302_v18 = vpop.f32.mrf.mxu0 }
 0x246   : > { %v1339_v5 = vpop.f32.mrf.mxu1  ;;  %v1303_v34 = vadd.f32 %v1302_v18, %v1260_v24 }
 0x247   : > { %v1340_v38 = vadd.f32 %v1339_v5, %v1298_v62  ;;  %v1719_v41 = vpop.eup %1718 }
 0x248   : > { %v1267_v60 = vpop.f32.mrf.mxu3  ;;  %v1472_v50 = vmul.f32 %v1719_v41, %v1464_v42 }
 0x249   : > { %v1390_v14 = vpop.f32.mrf.mxu2  ;;  %v1268_v39 = vadd.f32 %v1267_v60, %v1215_v57 }
 0x24a   : > { %v1391_v21 = vadd.f32 %v1390_v14, %v1340_v38  ;;  %v1476_v26 = vadd.f32 %v1475_v4, %v1472_v50 }
 0x24c   : > { %v1477_v56 = vrot.slane %v1476_v26, 4 }
 0x24d   : > { %v1307_v23 = vpop.f32.mrf.mxu0 }
 0x24e   : > { %v1345_v48 = vpop.f32.mrf.mxu1  ;;  %v1308_v35 = vadd.f32 %v1307_v23, %v1264_v33  ;;  %v1478_v28 = vadd.f32 %v1477_v56, %v1476_v26 }
 0x24f   : > { %v1346_v15 = vadd.f32 %v1345_v48, %v1303_v34 }
 0x250   : > { %v1427_v55 = vpop.f32.mrf.mxu3  ;;  %v1479_v53 = vrot.slane %v1478_v28, 2 }
 0x251   : > { %v1394_v17 = vpop.f32.mrf.mxu2  ;;  %v1428_v59 = vadd.f32 %v1427_v55, %v1391_v21 }
 0x252   : > { %v1395_v8 = vadd.f32 %v1394_v17, %v1346_v15  ;;  %v1480_v18 = vadd.f32 %v1479_v53, %v1478_v28  ;;  %v1494_v17 = vpop.permute.xlu2 %1493 }
 0x254   : > { %v1481_v31 = vrot.slane %v1480_v18, 1 }
 0x255   : > { %v1312_v22 = vpop.f32.mrf.mxu0 }
 0x256   : > { %v1351_v27 = vpop.f32.mrf.mxu1  ;;  %v1313_v11 = vadd.f32 %v1312_v22, %v1268_v39 }
 0x257   : > { %v1352_v3 = vadd.f32 %v1351_v27, %v1308_v35 }
 0x258   : > { %v1431_v51 = vpop.f32.mrf.mxu3 }
 0x259   : > { %v1398_v25 = vpop.f32.mrf.mxu2  ;;  %v1432_v29 = vadd.f32 %v1431_v51, %v1395_v8 }
 0x25a   : > { %v1399_v13 = vadd.f32 %v1398_v25, %v1352_v3 }
 0x25b   : > { %1720 = vtanh.f32 %v1432_v29 }
 0x25c   : > { %1722 = vtanh.f32 %v1428_v59 }
 0x25e   : > { %v1357_v40 = vpop.f32.mrf.mxu1 }
 0x25f   : > { %v1358_v45 = vadd.f32 %v1357_v40, %v1313_v11 }
 0x260   : > { %v1435_v7 = vpop.f32.mrf.mxu3 }
 0x261   : > { %v1436_v43 = vadd.f32 %v1435_v7, %v1399_v13  ;;  %v1402_v52 = vpop.f32.mrf.mxu2  ;;  %v1721_v54 = vpop.eup %1720 }
 0x262   : > { %v1403_v10 = vadd.f32 %v1402_v52, %v1358_v45  ;;  %v1723_v37 = vpop.eup %1722  ;;  %v1469_v46 = vmul.f32 %v1721_v54, %v2308_v36 }
 0x263   : > { %1724 = vtanh.f32 %v1436_v43  ;;  %v1467_v61 = vmul.f32 %v1723_v37, %v2306_v9  ;;  %v1482_v9 = vadd.f32 %v1481_v31, %v1480_v18 }
 0x265   : > { %v1483_v6 = vadd.f32 %v1469_v46, %v1467_v61  ;;  %v1496_v20 = vadd.f32 %v1494_v17, %v1482_v9 }
 0x268   : > { %v1439_v49 = vpop.f32.mrf.mxu3 }
 0x269   : > { %v1440_v30 = vadd.f32 %v1439_v49, %v1403_v10  ;;  %v1725_v16 = vpop.eup %1724 }
 0x26a   : > { %v1471_v0 = vmul.f32 %v1725_v16, %v2312_v58 }
 0x26b   : > { %1726 = vtanh.f32 %v1440_v30 }
 0x26c   : > { %v1484_v5 = vadd.f32 %v1483_v6, %v1471_v0 }
 0x271   : > { %v1727_v2 = vpop.eup %1726 }
 0x272   : > { %v1473_v4 = vmul.f32 %v1727_v2, %v1464_v42 }
 0x274   : > { %v1485_v60 = vadd.f32 %v1484_v5, %v1473_v4 }
 0x276   : > { %v1486_v14 = vrot.slane %v1485_v60, 4 }
 0x278   : > { %v1487_v44 = vadd.f32 %v1486_v14, %v1485_v60 }
 0x27a   : > { %v1488_v48 = vrot.slane %v1487_v44, 2 }
 0x27c   : > { %v1489_v55 = vadd.f32 %v1488_v48, %v1487_v44 }
 0x27e   : > { %v1490_v36 = vrot.slane %v1489_v55, 1 }
 0x280   : > { %v1491_v58 = vadd.f32 %v1490_v36, %v1489_v55 }
 0x282   : > { %v1497_v19 = vadd.f32 %v1494_v17, %v1491_v58 }
 0x284   : > { %v1500_v1 = vrot.slane %v1497_v19, 7 }
 0x286   : > { %v1502_v23 = vsel %vm1501_vm1, %v1496_v20, %v1500_v1 }
 0x287   : > { %1508 = vst.msk [vmem:[%s179_s30] sm:$0x3] %vm1506_vm2, %v1502_v23 }
 0x288   : > { %1785 = shalt.err (!%p1782_p8)
}
 0x289   : > { %1609 = dma.vmem_to_hbm [thread:$0]  (%p1893_p5), %s1523_s4, 32, %s1525_s5, %s1510_s6  }
 0x28a PF: > { %p1621_p9 = scmp.ge.s32.totalorder %s1824_s15, 2  ;;  %s1536_s20 = sand.u32 1, %s1812_s12  }
 0x28b   : > { %s1537_s24 = scalar_lea.sflag [#allocation4], %s1536_s20 }
 0x28c   : > { %p1616_p10 = pnand %p1621_p9, %p1897_p6 }
 0x28e   : > { %p1617_p11 = pneg %p1616_p10 }
 0x290   : > { %1807 = dma.done.wait (%p1617_p11), %s1537_s24, 32  }
 0x291   : > { %1809 = vsyncadd (%p1617_p11), %s1537_s24, 4294967264  ;;  %p14_p12 = scmp.ge.s32.totalorder %s1880_s18, 4   ;;  %s2359_s12 = smov %s1816_s13 }
 0x292   : > { %s2360_s13 = smov %s1820_s14  ;;  %s2361_s14 = smov %s1891_s21 }
 0x293   : > { %s2362_s15 = smov %s1880_s18  ;;  %16 = sbr.rel (!%p14_p12) target bundleno = 4 (0x4), region = 73 }
 0x298   :  { %1543 = vsyncpa [#allocation3], 1 }
 0x299   :  { %1545 = vsyncpa [#allocation3 + $0x1], 1 }
 0x29a   :  { %1546 = vsyncpa [#allocation4], 1 }
 0x29b   :  { %1548 = vsyncpa [#allocation4 + $0x1], 1 }

</bundles_post_ra>
